<compile_context>
chip_gen: v5e
topology: v5e:2x2
jax: 0.10.0
libtpu: 0.0.40
codegen_flags: <defaults>
</compile_context>

<pallas_src>
import functools

import jax
import jax.numpy as jnp
from jax.experimental import pallas as pl
from jax.experimental.pallas import tpu as pltpu


# ----------------------------- kernel ---------------------------------------

def _gdl_ce_kernel(logits_ref, labels_ref, tp_ref, sp_ref, vol_ref, ce_ref,
                   *, n_valid, need_mask):
    k = pl.program_id(2)                    # pixel-tile (reduction) index

    @pl.when(k == 0)
    def _():
        tp_ref[...] = jnp.zeros_like(tp_ref)
        sp_ref[...] = jnp.zeros_like(sp_ref)
        vol_ref[...] = jnp.zeros_like(vol_ref)
        ce_ref[...] = jnp.zeros_like(ce_ref)

    C = logits_ref.shape[1]
    TR = logits_ref.shape[2]
    FOLD = tp_ref.shape[3]

    x = logits_ref[0].astype(jnp.float32)        # (C, TR, 128) cast in-kernel
    lab = labels_ref[0, 0].astype(jnp.int32)     # (TR, 128)

    # Softmax over the leading class axis: elementwise max/add over C slabs
    # (pure VALU, fully dense vregs regardless of C).
    m = jnp.max(x, axis=0)                       # (TR, 128)
    e = jnp.exp(x - m[None])                     # (C, TR, 128)
    d = jnp.sum(e, axis=0)                       # (TR, 128)
    r = pl.reciprocal(d, approx=False)           # exact: keeps 1e-5 tolerance
    lse = m + jnp.log(d)                         # (TR, 128)

    if need_mask:
        # Pad pixels (zero-filled by the wrapper) are excluded from all sums by
        # (a) mapping their label to -1 and (b) zeroing their 1/denominator.
        s = pl.program_id(1)
        kt = pl.num_programs(2)
        base = (s * kt + k) * TR
        row = jax.lax.broadcasted_iota(jnp.int32, (TR, 128), 0)
        lane = jax.lax.broadcasted_iota(jnp.int32, (TR, 128), 1)
        valid = ((base + row) * 128 + lane) < n_valid
        lab = jnp.where(valid, lab, -1)
        r = jnp.where(valid, r, 0.0)

    zero = jnp.float32(0.0)

    def fold_rows(a):                            # (TR, 128) -> (FOLD, 128)
        if FOLD == 8:
            return a.reshape(TR // 8, 8, 128).sum(axis=0)   # VALU slab adds
        return a.sum(axis=0, keepdims=True)      # tiny-tile fallback

    # Short static per-class loop: only (TR, 128)-sized temporaries are live.
    logit_lab = jnp.zeros((TR, 128), jnp.float32)
    for c in range(C):
        p_c = e[c] * r                           # (TR, 128); 0 at pad pixels
        hit_c = lab == c                         # (TR, 128) bool one-hot mask
        tp_ref[0, 0, c] += fold_rows(jnp.where(hit_c, p_c, zero))
        sp_ref[0, 0, c] += fold_rows(p_c)
        vol_ref[0, 0, c] += fold_rows(hit_c.astype(jnp.float32))
        logit_lab = logit_lab + jnp.where(hit_c, x[c], zero)

    # Cross entropy: logsumexp - logit_at_label, masked at pad pixels.
    ce_term = lse - logit_lab
    if need_mask:
        ce_term = jnp.where(valid, ce_term, zero)
    ce_ref[0, 0] += fold_rows(ce_term)


# ----------------------------- wrapper ---------------------------------------

def _device_kind():
    try:
        return jax.devices()[0].device_kind.lower()
    except Exception:
        return ""


def _auto_nsplit(B):
    # Only 2-TensorCore chips (v7x) benefit from an extra spatial split, and
    # only when the (parallel) batch axis alone cannot occupy both cores.
    if B % 2 == 0:
        return 1
    return 2 if "v7" in _device_kind() else 1


def _vmem_limit_bytes():
    # v5e/v6e have 128 MiB physical VMEM; v7x only 64 MiB per TensorCore.
    return (48 if "v7" in _device_kind() else 64) * 1024 * 1024


def _choose_tiling(C, N, nsplit):
    """Pick (TR, kt, NR_pad, nsplit, FOLD) for the (NR, 128) pixel layout."""
    NR = -(-N // 128)                            # rows of 128 pixels
    # ~2 MiB of f32-equivalent logits per tile.
    tr_cap = max(8, ((2 << 20) // (C * 128 * 4)) // 8 * 8)
    if NR <= tr_cap:
        tr = NR                                  # full extent: always legal
        kt_total = 1
    else:
        # Largest multiple-of-8 tile <= cap that divides NR exactly: avoids
        # both a full-tensor pad and ragged final blocks.
        tr = 0
        t = tr_cap
        while t >= 8:
            if NR % t == 0:
                tr = t
                break
            t -= 8
        if tr == 0:
            tr = tr_cap                          # pathological NR: pad up
        kt_total = -(-NR // tr)
    if nsplit > 1 and (kt_total % nsplit != 0):
        nsplit = 1                               # avoid empty/uneven splits
    kt = kt_total // nsplit
    nr_pad = nsplit * kt * tr
    fold = 8 if tr % 8 == 0 else 1
    return tr, kt, nr_pad, nsplit, fold


def _run_kernel(logits, labels, n_valid, nsplit, tr, kt, fold, need_mask):
    B, C = logits.shape[0], logits.shape[1]
    stat_shape = jax.ShapeDtypeStruct((B, nsplit, C, fold, 128), jnp.float32)
    ce_shape = jax.ShapeDtypeStruct((B, nsplit, fold, 128), jnp.float32)
    stat_spec = pl.BlockSpec((1, 1, C, fold, 128), lambda b, s, k: (b, s, 0, 0, 0))
    ce_spec = pl.BlockSpec((1, 1, fold, 128), lambda b, s, k: (b, s, 0, 0))
    kernel = functools.partial(_gdl_ce_kernel, n_valid=n_valid,
                               need_mask=need_mask)
    return pl.pallas_call(
        kernel,
        out_shape=(stat_shape, stat_shape, stat_shape, ce_shape),
        grid_spec=pltpu.PrefetchScalarGridSpec(
            num_scalar_prefetch=0,
            grid=(B, nsplit, kt),
            in_specs=[
                pl.BlockSpec((1, C, tr, 128), lambda b, s, k: (b, 0, s * kt + k, 0)),
                pl.BlockSpec((1, 1, tr, 128), lambda b, s, k: (b, 0, s * kt + k, 0)),
            ],
            out_specs=[stat_spec, stat_spec, stat_spec, ce_spec],
        ),
        compiler_params=pltpu.CompilerParams(
            dimension_semantics=("parallel", "parallel", "arbitrary"),
            vmem_limit_bytes=_vmem_limit_bytes(),
        ),
    )(logits, labels)


def _gdl_ce_stats(net_output, target, nsplit=None):
    """Per-(batch, class) tp / sum_p / volume, per-batch CE sum, and N."""
    if target.ndim == net_output.ndim - 1:
        target = target[:, None]
    B, C = net_output.shape[:2]
    N = 1
    for d in net_output.shape[2:]:
        N *= d
    if nsplit is None:
        nsplit = _auto_nsplit(B)
    tr, kt, nr_pad, nsplit, fold = _choose_tiling(C, N, nsplit)
    n_pad = nr_pad * 128

    logits = net_output.reshape(B, C, N)     # native dtype; cast inside kernel
    labels = target.reshape(B, 1, N)
    if n_pad != N:                           # only for ragged / pathological N
        logits = jnp.pad(logits, ((0, 0), (0, 0), (0, n_pad - N)))
        labels = jnp.pad(labels, ((0, 0), (0, 0), (0, n_pad - N)))
    logits = logits.reshape(B, C, nr_pad, 128)
    labels = labels.reshape(B, 1, nr_pad, 128)

    tp, sp, vol, ce = _run_kernel(logits, labels, N, nsplit, tr, kt, fold,
                                  need_mask=(n_pad != N))
    tp = tp.sum(axis=(1, 3, 4))              # (B, C)
    sp = sp.sum(axis=(1, 3, 4))
    vol = vol.sum(axis=(1, 3, 4))
    ce = ce.sum(axis=(1, 2, 3))              # (B,)
    return tp, sp, vol, ce, N


def gdl_loss(net_output, target, *, smooth=1.0, batch_dice=False, do_bg=True,
             square_volumes=False):
    """GDL(apply_nonlin=softmax_helper, batch_dice, do_bg, smooth,
    square=False, square_volumes).forward(net_output, target)."""
    # TODO(synk): square=True, loss_mask and non-softmax apply_nonlin would need
    # per-element squared/masked sums and are not implemented.
    tp, sp, vol, _, _ = _gdl_ce_stats(net_output, target)
    fp = sp - tp                             # sum(p*(1-onehot)) = sum_p - tp
    fn = vol - tp                            # sum((1-p)*onehot) = vol - tp
    if not do_bg:
        tp, fp, fn, vol = tp[:, 1:], fp[:, 1:], fn[:, 1:], vol[:, 1:]
    if batch_dice:
        tp, fp, fn, vol = tp.sum(0), fp.sum(0), fn.sum(0), vol.sum(0)
    volumes = vol + 1e-6
    if square_volumes:
        volumes = volumes ** 2
    tp = tp / volumes
    fp = fp / volumes
    fn = fn / volumes
    axis = 0 if batch_dice else 1
    tp, fp, fn = tp.sum(axis), fp.sum(axis), fn.sum(axis)
    dc = (2.0 * tp + smooth) / (2.0 * tp + fp + fn + smooth)
    return -jnp.mean(dc)


def gdl_and_ce_loss(net_output, target, *, smooth=1.0):
    """GDL_and_CE_loss(gdl_dice_kwargs={}, ce_kwargs={}, aggregate='sum')."""
    tp, sp, vol, ce_sum, N = _gdl_ce_stats(net_output, target)
    fp = sp - tp
    fn = vol - tp
    volumes = vol + 1e-6
    tp, fp, fn = tp / volumes, fp / volumes, fn / volumes
    tp, fp, fn = tp.sum(1), fp.sum(1), fn.sum(1)
    dc = (2.0 * tp + smooth) / (2.0 * tp + fp + fn + smooth)
    dc_loss = -jnp.mean(dc)
    B = net_output.shape[0]
    ce_loss = jnp.sum(ce_sum) / (B * N)
    return ce_loss + dc_loss


# ----------------------------- pure-JAX references ---------------------------

def _reference_gdl(net_output, target, smooth=1.0):
    B, C = net_output.shape[:2]
    x = jax.nn.softmax(net_output.astype(jnp.float32), axis=1)
    lab = target.reshape(B, *net_output.shape[2:]).astype(jnp.int32)
    y = jax.nn.one_hot(lab, C, axis=1, dtype=jnp.float32)
    axes = tuple(range(2, net_output.ndim))
    tp = jnp.sum(x * y, axis=axes)
    fp = jnp.sum(x * (1 - y), axis=axes)
    fn = jnp.sum((1 - x) * y, axis=axes)
    volumes = jnp.sum(y, axis=axes) + 1e-6
    tp, fp, fn = tp / volumes, fp / volumes, fn / volumes
    tp, fp, fn = tp.sum(1), fp.sum(1), fn.sum(1)
    dc = (2 * tp + smooth) / (2 * tp + fp + fn + smooth)
    return -dc.mean()


def _reference_ce(net_output, target):
    B, C = net_output.shape[:2]
    lab = target.reshape(B, *net_output.shape[2:]).astype(jnp.int32)
    logp = jax.nn.log_softmax(net_output.astype(jnp.float32), axis=1)
    y = jax.nn.one_hot(lab, C, axis=1, dtype=jnp.float32)
    return -jnp.mean(jnp.sum(logp * y, axis=1))


if __name__ == "__main__":
    key = jax.random.PRNGKey(0)
    k1, k2, k3, k4, k5, k6 = jax.random.split(key, 6)

    # Case 1: B=2, C=4, 16x16 (N multiple of 128; no padding, no mask path).
    B, C, H, W = 2, 4, 16, 16
    net_output = jax.random.normal(k1, (B, C, H, W), dtype=jnp.float32)
    target = jax.random.randint(k2, (B, 1, H, W), 0, C).astype(jnp.float32)
    gdl = jax.block_until_ready(gdl_loss(net_output, target))
    both = jax.block_until_ready(gdl_and_ce_loss(net_output, target))
    gdl_ref = _reference_gdl(net_output, target)
    both_ref = gdl_ref + _reference_ce(net_output, target)
    assert jnp.allclose(gdl, gdl_ref, atol=1e-5, rtol=1e-5), (gdl, gdl_ref)
    assert jnp.allclose(both, both_ref, atol=1e-5, rtol=1e-5), (both, both_ref)

    # Case 2: odd spatial size and B=1 (exercises the padded-tail mask).
    B, C, H, W = 1, 5, 13, 11
    net_output = jax.random.normal(k3, (B, C, H, W), dtype=jnp.float32)
    target = jax.random.randint(k4, (B, 1, H, W), 0, C).astype(jnp.float32)
    gdl = jax.block_until_ready(gdl_loss(net_output, target))
    gdl_ref = _reference_gdl(net_output, target)
    assert jnp.allclose(gdl, gdl_ref, atol=1e-5, rtol=1e-5), (gdl, gdl_ref)

    # Case 3: larger C and non-divisible row count -> multiple k-tiles with the
    # resident accumulators, fold=8 path, and masking all exercised together.
    B, C, H, W = 1, 64, 129, 128
    net_output = jax.random.normal(k5, (B, C, H, W), dtype=jnp.float32)
    target = jax.random.randint(k6, (B, 1, H, W), 0, C).astype(jnp.float32)
    both = jax.block_until_ready(gdl_and_ce_loss(net_output, target))
    both_ref = _reference_gdl(net_output, target) + _reference_ce(net_output, target)
    assert jnp.allclose(both, both_ref, atol=1e-4, rtol=1e-4), (both, both_ref)

    print("KERNEL_OK")
</pallas_src>

<mosaic_0001>
module attributes {stable_mosaic.version = 11 : i64} {
  func.func @_gdl_ce_kernel(%arg0: i32, %arg1: i32, %arg2: i32, %arg3: memref<1x4x2x128xf32, #tpu.memory_space<vmem>>, %arg4: memref<1x1x2x128xf32, #tpu.memory_space<vmem>>, %arg5: memref<1x1x4x1x128xf32, #tpu.memory_space<vmem>>, %arg6: memref<1x1x4x1x128xf32, #tpu.memory_space<vmem>>, %arg7: memref<1x1x4x1x128xf32, #tpu.memory_space<vmem>>, %arg8: memref<1x1x1x128xf32, #tpu.memory_space<vmem>>) attributes {dimension_semantics = [#tpu.dimension_semantics<parallel>, #tpu.dimension_semantics<parallel>, #tpu.dimension_semantics<arbitrary>], iteration_bounds = array<i64: 2, 1, 1>, scalar_prefetch = 0 : i64, scratch_operands = 0 : i64, tpu.core_type = #tpu.core_type<tc>, window_params = [{transform_indices = @transform_0, window_bounds = array<i64: 1, 4, 2, 128>}, {transform_indices = @transform_1, window_bounds = array<i64: 1, 1, 2, 128>}, {transform_indices = @transform_2, window_bounds = array<i64: 1, 1, 4, 1, 128>}, {transform_indices = @transform_3, window_bounds = array<i64: 1, 1, 4, 1, 128>}, {transform_indices = @transform_4, window_bounds = array<i64: 1, 1, 4, 1, 128>}, {transform_indices = @transform_5, window_bounds = array<i64: 1, 1, 1, 128>}]} {
    %c0_i32 = arith.constant 0 : i32
    %0 = arith.cmpi eq, %arg2, %c0_i32 : i32
    %1 = arith.extui %0 : i1 to i32
    %c0_i32_0 = arith.constant 0 : i32
    %2 = arith.cmpi ne, %1, %c0_i32_0 : i32
    scf.if %2 {
      %cst_157 = arith.constant 0.000000e+00 : f32
      %179 = vector.broadcast %cst_157 : f32 to vector<1x1x4x1x128xf32>
      %c0_158 = arith.constant 0 : index
      %c0_159 = arith.constant 0 : index
      %c0_160 = arith.constant 0 : index
      %c0_161 = arith.constant 0 : index
      %c0_162 = arith.constant 0 : index
      %180 = vector.load %arg5[%c0_158, %c0_159, %c0_160, %c0_161, %c0_162] : memref<1x1x4x1x128xf32, #tpu.memory_space<vmem>>, vector<1x1x4x1x128xf32>
      tpu.vector_store %arg5[%c0_158, %c0_159, %c0_160, %c0_161, %c0_162], %179 {strides = array<i32>} : memref<1x1x4x1x128xf32, #tpu.memory_space<vmem>>, vector<1x1x4x1x128xf32>,
      %cst_163 = arith.constant 0.000000e+00 : f32
      %181 = vector.broadcast %cst_163 : f32 to vector<1x1x4x1x128xf32>
      %c0_164 = arith.constant 0 : index
      %c0_165 = arith.constant 0 : index
      %c0_166 = arith.constant 0 : index
      %c0_167 = arith.constant 0 : index
      %c0_168 = arith.constant 0 : index
      %182 = vector.load %arg6[%c0_164, %c0_165, %c0_166, %c0_167, %c0_168] : memref<1x1x4x1x128xf32, #tpu.memory_space<vmem>>, vector<1x1x4x1x128xf32>
      tpu.vector_store %arg6[%c0_164, %c0_165, %c0_166, %c0_167, %c0_168], %181 {strides = array<i32>} : memref<1x1x4x1x128xf32, #tpu.memory_space<vmem>>, vector<1x1x4x1x128xf32>,
      %cst_169 = arith.constant 0.000000e+00 : f32
      %183 = vector.broadcast %cst_169 : f32 to vector<1x1x4x1x128xf32>
      %c0_170 = arith.constant 0 : index
      %c0_171 = arith.constant 0 : index
      %c0_172 = arith.constant 0 : index
      %c0_173 = arith.constant 0 : index
      %c0_174 = arith.constant 0 : index
      %184 = vector.load %arg7[%c0_170, %c0_171, %c0_172, %c0_173, %c0_174] : memref<1x1x4x1x128xf32, #tpu.memory_space<vmem>>, vector<1x1x4x1x128xf32>
      tpu.vector_store %arg7[%c0_170, %c0_171, %c0_172, %c0_173, %c0_174], %183 {strides = array<i32>} : memref<1x1x4x1x128xf32, #tpu.memory_space<vmem>>, vector<1x1x4x1x128xf32>,
      %cst_175 = arith.constant 0.000000e+00 : f32
      %185 = vector.broadcast %cst_175 : f32 to vector<1x1x1x128xf32>
      %c0_176 = arith.constant 0 : index
      %c0_177 = arith.constant 0 : index
      %c0_178 = arith.constant 0 : index
      %c0_179 = arith.constant 0 : index
      %186 = vector.load %arg8[%c0_176, %c0_177, %c0_178, %c0_179] : memref<1x1x1x128xf32, #tpu.memory_space<vmem>>, vector<1x1x1x128xf32>
      tpu.vector_store %arg8[%c0_176, %c0_177, %c0_178, %c0_179], %185 {strides = array<i32>} : memref<1x1x1x128xf32, #tpu.memory_space<vmem>>, vector<1x1x1x128xf32>,
    } else {
    }
    %c0 = arith.constant 0 : index
    %c0_1 = arith.constant 0 : index
    %c0_2 = arith.constant 0 : index
    %c0_3 = arith.constant 0 : index
    %3 = vector.load %arg3[%c0, %c0_1, %c0_2, %c0_3] : memref<1x4x2x128xf32, #tpu.memory_space<vmem>>, vector<1x4x2x128xf32>
    %4 = vector.shape_cast %3 : vector<1x4x2x128xf32> to vector<4x2x128xf32>
    %c0_4 = arith.constant 0 : index
    %c0_5 = arith.constant 0 : index
    %c0_6 = arith.constant 0 : index
    %c0_7 = arith.constant 0 : index
    %5 = vector.load %arg4[%c0_4, %c0_5, %c0_6, %c0_7] : memref<1x1x2x128xf32, #tpu.memory_space<vmem>>, vector<1x1x2x128xf32>
    %6 = vector.shape_cast %5 : vector<1x1x2x128xf32> to vector<2x128xf32>
    %7 = arith.fptosi %6 : vector<2x128xf32> to vector<2x128xi32>
    %cst = arith.constant dense<0xFF800000> : vector<2x128xf32>
    %8 = vector.multi_reduction <maximumf>, %4, %cst [0] : vector<4x2x128xf32> to vector<2x128xf32>
    %9 = vector.shape_cast %8 : vector<2x128xf32> to vector<1x2x128xf32>
    %10 = vector.broadcast %9 : vector<1x2x128xf32> to vector<4x2x128xf32>
    %11 = arith.subf %4, %10 : vector<4x2x128xf32>
    %12 = math.exp %11 : vector<4x2x128xf32>
    %cst_8 = arith.constant dense<0.000000e+00> : vector<2x128xf32>
    %13 = vector.multi_reduction <add>, %12, %cst_8 [0] : vector<4x2x128xf32> to vector<2x128xf32>
    %14 = tpu.reciprocal %13 : vector<2x128xf32> -> vector<2x128xf32>
    %15 = math.log %13 : vector<2x128xf32>
    %16 = arith.addf %8, %15 : vector<2x128xf32>
    %cst_9 = arith.constant 0.000000e+00 : f32
    %17 = vector.broadcast %cst_9 : f32 to vector<2x128xf32>
    %18 = vector.extract_strided_slice %12 {offsets = [0, 0, 0], sizes = [1, 2, 128], strides = [1, 1, 1]} : vector<4x2x128xf32> to vector<1x2x128xf32>
    %19 = vector.shape_cast %18 : vector<1x2x128xf32> to vector<2x128xf32>
    %20 = arith.mulf %19, %14 : vector<2x128xf32>
    %c0_i32_10 = arith.constant 0 : i32
    %21 = vector.broadcast %c0_i32_10 : i32 to vector<2x128xi32>
    %22 = arith.cmpi eq, %7, %21 : vector<2x128xi32>
    %c0_11 = arith.constant 0 : index
    %c0_12 = arith.constant 0 : index
    %c0_13 = arith.constant 0 : index
    %c0_14 = arith.constant 0 : index
    %c0_15 = arith.constant 0 : index
    %23 = vector.load %arg5[%c0_11, %c0_12, %c0_13, %c0_14, %c0_15] : memref<1x1x4x1x128xf32, #tpu.memory_space<vmem>>, vector<1x1x1x1x128xf32>
    %24 = vector.shape_cast %23 : vector<1x1x1x1x128xf32> to vector<1x128xf32>
    %cst_16 = arith.constant 0.000000e+00 : f32
    %25 = vector.broadcast %cst_16 : f32 to vector<2x128xf32>
    %26 = arith.select %22, %20, %25 : vector<2x128xi1>, vector<2x128xf32>
    %cst_17 = arith.constant dense<0.000000e+00> : vector<128xf32>
    %27 = vector.multi_reduction <add>, %26, %cst_17 [0] : vector<2x128xf32> to vector<128xf32>
    %28 = vector.shape_cast %27 : vector<128xf32> to vector<1x128xf32>
    %29 = arith.addf %24, %28 : vector<1x128xf32>
    %c0_18 = arith.constant 0 : index
    %c0_19 = arith.constant 0 : index
    %c0_20 = arith.constant 0 : index
    %c0_21 = arith.constant 0 : index
    %c0_22 = arith.constant 0 : index
    %30 = vector.load %arg5[%c0_18, %c0_19, %c0_20, %c0_21, %c0_22] : memref<1x1x4x1x128xf32, #tpu.memory_space<vmem>>, vector<1x1x1x1x128xf32>
    %31 = vector.shape_cast %30 : vector<1x1x1x1x128xf32> to vector<1x128xf32>
    %32 = vector.shape_cast %29 : vector<1x128xf32> to vector<1x1x1x1x128xf32>
    tpu.vector_store %arg5[%c0_18, %c0_19, %c0_20, %c0_21, %c0_22], %32 {strides = array<i32>} : memref<1x1x4x1x128xf32, #tpu.memory_space<vmem>>, vector<1x1x1x1x128xf32>,
    %c0_23 = arith.constant 0 : index
    %c0_24 = arith.constant 0 : index
    %c0_25 = arith.constant 0 : index
    %c0_26 = arith.constant 0 : index
    %c0_27 = arith.constant 0 : index
    %33 = vector.load %arg6[%c0_23, %c0_24, %c0_25, %c0_26, %c0_27] : memref<1x1x4x1x128xf32, #tpu.memory_space<vmem>>, vector<1x1x1x1x128xf32>
    %34 = vector.shape_cast %33 : vector<1x1x1x1x128xf32> to vector<1x128xf32>
    %cst_28 = arith.constant dense<0.000000e+00> : vector<128xf32>
    %35 = vector.multi_reduction <add>, %20, %cst_28 [0] : vector<2x128xf32> to vector<128xf32>
    %36 = vector.shape_cast %35 : vector<128xf32> to vector<1x128xf32>
    %37 = arith.addf %34, %36 : vector<1x128xf32>
    %c0_29 = arith.constant 0 : index
    %c0_30 = arith.constant 0 : index
    %c0_31 = arith.constant 0 : index
    %c0_32 = arith.constant 0 : index
    %c0_33 = arith.constant 0 : index
    %38 = vector.load %arg6[%c0_29, %c0_30, %c0_31, %c0_32, %c0_33] : memref<1x1x4x1x128xf32, #tpu.memory_space<vmem>>, vector<1x1x1x1x128xf32>
    %39 = vector.shape_cast %38 : vector<1x1x1x1x128xf32> to vector<1x128xf32>
    %40 = vector.shape_cast %37 : vector<1x128xf32> to vector<1x1x1x1x128xf32>
    tpu.vector_store %arg6[%c0_29, %c0_30, %c0_31, %c0_32, %c0_33], %40 {strides = array<i32>} : memref<1x1x4x1x128xf32, #tpu.memory_space<vmem>>, vector<1x1x1x1x128xf32>,
    %c0_34 = arith.constant 0 : index
    %c0_35 = arith.constant 0 : index
    %c0_36 = arith.constant 0 : index
    %c0_37 = arith.constant 0 : index
    %c0_38 = arith.constant 0 : index
    %41 = vector.load %arg7[%c0_34, %c0_35, %c0_36, %c0_37, %c0_38] : memref<1x1x4x1x128xf32, #tpu.memory_space<vmem>>, vector<1x1x1x1x128xf32>
    %42 = vector.shape_cast %41 : vector<1x1x1x1x128xf32> to vector<1x128xf32>
    %43 = arith.extui %22 : vector<2x128xi1> to vector<2x128xi32>
    %44 = arith.sitofp %43 : vector<2x128xi32> to vector<2x128xf32>
    %cst_39 = arith.constant dense<0.000000e+00> : vector<128xf32>
    %45 = vector.multi_reduction <add>, %44, %cst_39 [0] : vector<2x128xf32> to vector<128xf32>
    %46 = vector.shape_cast %45 : vector<128xf32> to vector<1x128xf32>
    %47 = arith.addf %42, %46 : vector<1x128xf32>
    %c0_40 = arith.constant 0 : index
    %c0_41 = arith.constant 0 : index
    %c0_42 = arith.constant 0 : index
    %c0_43 = arith.constant 0 : index
    %c0_44 = arith.constant 0 : index
    %48 = vector.load %arg7[%c0_40, %c0_41, %c0_42, %c0_43, %c0_44] : memref<1x1x4x1x128xf32, #tpu.memory_space<vmem>>, vector<1x1x1x1x128xf32>
    %49 = vector.shape_cast %48 : vector<1x1x1x1x128xf32> to vector<1x128xf32>
    %50 = vector.shape_cast %47 : vector<1x128xf32> to vector<1x1x1x1x128xf32>
    tpu.vector_store %arg7[%c0_40, %c0_41, %c0_42, %c0_43, %c0_44], %50 {strides = array<i32>} : memref<1x1x4x1x128xf32, #tpu.memory_space<vmem>>, vector<1x1x1x1x128xf32>,
    %51 = vector.extract_strided_slice %4 {offsets = [0, 0, 0], sizes = [1, 2, 128], strides = [1, 1, 1]} : vector<4x2x128xf32> to vector<1x2x128xf32>
    %52 = vector.shape_cast %51 : vector<1x2x128xf32> to vector<2x128xf32>
    %cst_45 = arith.constant 0.000000e+00 : f32
    %53 = vector.broadcast %cst_45 : f32 to vector<2x128xf32>
    %54 = arith.select %22, %52, %53 : vector<2x128xi1>, vector<2x128xf32>
    %55 = arith.addf %17, %54 : vector<2x128xf32>
    %56 = vector.extract_strided_slice %12 {offsets = [1, 0, 0], sizes = [1, 2, 128], strides = [1, 1, 1]} : vector<4x2x128xf32> to vector<1x2x128xf32>
    %57 = vector.shape_cast %56 : vector<1x2x128xf32> to vector<2x128xf32>
    %58 = arith.mulf %57, %14 : vector<2x128xf32>
    %c1_i32 = arith.constant 1 : i32
    %59 = vector.broadcast %c1_i32 : i32 to vector<2x128xi32>
    %60 = arith.cmpi eq, %7, %59 : vector<2x128xi32>
    %c0_46 = arith.constant 0 : index
    %c0_47 = arith.constant 0 : index
    %c1 = arith.constant 1 : index
    %c0_48 = arith.constant 0 : index
    %c0_49 = arith.constant 0 : index
    %61 = vector.load %arg5[%c0_46, %c0_47, %c1, %c0_48, %c0_49] : memref<1x1x4x1x128xf32, #tpu.memory_space<vmem>>, vector<1x1x1x1x128xf32>
    %62 = vector.shape_cast %61 : vector<1x1x1x1x128xf32> to vector<1x128xf32>
    %cst_50 = arith.constant 0.000000e+00 : f32
    %63 = vector.broadcast %cst_50 : f32 to vector<2x128xf32>
    %64 = arith.select %60, %58, %63 : vector<2x128xi1>, vector<2x128xf32>
    %cst_51 = arith.constant dense<0.000000e+00> : vector<128xf32>
    %65 = vector.multi_reduction <add>, %64, %cst_51 [0] : vector<2x128xf32> to vector<128xf32>
    %66 = vector.shape_cast %65 : vector<128xf32> to vector<1x128xf32>
    %67 = arith.addf %62, %66 : vector<1x128xf32>
    %c0_52 = arith.constant 0 : index
    %c0_53 = arith.constant 0 : index
    %c1_54 = arith.constant 1 : index
    %c0_55 = arith.constant 0 : index
    %c0_56 = arith.constant 0 : index
    %68 = vector.load %arg5[%c0_52, %c0_53, %c1_54, %c0_55, %c0_56] : memref<1x1x4x1x128xf32, #tpu.memory_space<vmem>>, vector<1x1x1x1x128xf32>
    %69 = vector.shape_cast %68 : vector<1x1x1x1x128xf32> to vector<1x128xf32>
    %70 = vector.shape_cast %67 : vector<1x128xf32> to vector<1x1x1x1x128xf32>
    tpu.vector_store %arg5[%c0_52, %c0_53, %c1_54, %c0_55, %c0_56], %70 {strides = array<i32>} : memref<1x1x4x1x128xf32, #tpu.memory_space<vmem>>, vector<1x1x1x1x128xf32>,
    %c0_57 = arith.constant 0 : index
    %c0_58 = arith.constant 0 : index
    %c1_59 = arith.constant 1 : index
    %c0_60 = arith.constant 0 : index
    %c0_61 = arith.constant 0 : index
    %71 = vector.load %arg6[%c0_57, %c0_58, %c1_59, %c0_60, %c0_61] : memref<1x1x4x1x128xf32, #tpu.memory_space<vmem>>, vector<1x1x1x1x128xf32>
    %72 = vector.shape_cast %71 : vector<1x1x1x1x128xf32> to vector<1x128xf32>
    %cst_62 = arith.constant dense<0.000000e+00> : vector<128xf32>
    %73 = vector.multi_reduction <add>, %58, %cst_62 [0] : vector<2x128xf32> to vector<128xf32>
    %74 = vector.shape_cast %73 : vector<128xf32> to vector<1x128xf32>
    %75 = arith.addf %72, %74 : vector<1x128xf32>
    %c0_63 = arith.constant 0 : index
    %c0_64 = arith.constant 0 : index
    %c1_65 = arith.constant 1 : index
    %c0_66 = arith.constant 0 : index
    %c0_67 = arith.constant 0 : index
    %76 = vector.load %arg6[%c0_63, %c0_64, %c1_65, %c0_66, %c0_67] : memref<1x1x4x1x128xf32, #tpu.memory_space<vmem>>, vector<1x1x1x1x128xf32>
    %77 = vector.shape_cast %76 : vector<1x1x1x1x128xf32> to vector<1x128xf32>
    %78 = vector.shape_cast %75 : vector<1x128xf32> to vector<1x1x1x1x128xf32>
    tpu.vector_store %arg6[%c0_63, %c0_64, %c1_65, %c0_66, %c0_67], %78 {strides = array<i32>} : memref<1x1x4x1x128xf32, #tpu.memory_space<vmem>>, vector<1x1x1x1x128xf32>,
    %c0_68 = arith.constant 0 : index
    %c0_69 = arith.constant 0 : index
    %c1_70 = arith.constant 1 : index
    %c0_71 = arith.constant 0 : index
    %c0_72 = arith.constant 0 : index
    %79 = vector.load %arg7[%c0_68, %c0_69, %c1_70, %c0_71, %c0_72] : memref<1x1x4x1x128xf32, #tpu.memory_space<vmem>>, vector<1x1x1x1x128xf32>
    %80 = vector.shape_cast %79 : vector<1x1x1x1x128xf32> to vector<1x128xf32>
    %81 = arith.extui %60 : vector<2x128xi1> to vector<2x128xi32>
    %82 = arith.sitofp %81 : vector<2x128xi32> to vector<2x128xf32>
    %cst_73 = arith.constant dense<0.000000e+00> : vector<128xf32>
    %83 = vector.multi_reduction <add>, %82, %cst_73 [0] : vector<2x128xf32> to vector<128xf32>
    %84 = vector.shape_cast %83 : vector<128xf32> to vector<1x128xf32>
    %85 = arith.addf %80, %84 : vector<1x128xf32>
    %c0_74 = arith.constant 0 : index
    %c0_75 = arith.constant 0 : index
    %c1_76 = arith.constant 1 : index
    %c0_77 = arith.constant 0 : index
    %c0_78 = arith.constant 0 : index
    %86 = vector.load %arg7[%c0_74, %c0_75, %c1_76, %c0_77, %c0_78] : memref<1x1x4x1x128xf32, #tpu.memory_space<vmem>>, vector<1x1x1x1x128xf32>
    %87 = vector.shape_cast %86 : vector<1x1x1x1x128xf32> to vector<1x128xf32>
    %88 = vector.shape_cast %85 : vector<1x128xf32> to vector<1x1x1x1x128xf32>
    tpu.vector_store %arg7[%c0_74, %c0_75, %c1_76, %c0_77, %c0_78], %88 {strides = array<i32>} : memref<1x1x4x1x128xf32, #tpu.memory_space<vmem>>, vector<1x1x1x1x128xf32>,
    %89 = vector.extract_strided_slice %4 {offsets = [1, 0, 0], sizes = [1, 2, 128], strides = [1, 1, 1]} : vector<4x2x128xf32> to vector<1x2x128xf32>
    %90 = vector.shape_cast %89 : vector<1x2x128xf32> to vector<2x128xf32>
    %cst_79 = arith.constant 0.000000e+00 : f32
    %91 = vector.broadcast %cst_79 : f32 to vector<2x128xf32>
    %92 = arith.select %60, %90, %91 : vector<2x128xi1>, vector<2x128xf32>
    %93 = arith.addf %55, %92 : vector<2x128xf32>
    %94 = vector.extract_strided_slice %12 {offsets = [2, 0, 0], sizes = [1, 2, 128], strides = [1, 1, 1]} : vector<4x2x128xf32> to vector<1x2x128xf32>
    %95 = vector.shape_cast %94 : vector<1x2x128xf32> to vector<2x128xf32>
    %96 = arith.mulf %95, %14 : vector<2x128xf32>
    %c2_i32 = arith.constant 2 : i32
    %97 = vector.broadcast %c2_i32 : i32 to vector<2x128xi32>
    %98 = arith.cmpi eq, %7, %97 : vector<2x128xi32>
    %c0_80 = arith.constant 0 : index
    %c0_81 = arith.constant 0 : index
    %c2 = arith.constant 2 : index
    %c0_82 = arith.constant 0 : index
    %c0_83 = arith.constant 0 : index
    %99 = vector.load %arg5[%c0_80, %c0_81, %c2, %c0_82, %c0_83] : memref<1x1x4x1x128xf32, #tpu.memory_space<vmem>>, vector<1x1x1x1x128xf32>
    %100 = vector.shape_cast %99 : vector<1x1x1x1x128xf32> to vector<1x128xf32>
    %cst_84 = arith.constant 0.000000e+00 : f32
    %101 = vector.broadcast %cst_84 : f32 to vector<2x128xf32>
    %102 = arith.select %98, %96, %101 : vector<2x128xi1>, vector<2x128xf32>
    %cst_85 = arith.constant dense<0.000000e+00> : vector<128xf32>
    %103 = vector.multi_reduction <add>, %102, %cst_85 [0] : vector<2x128xf32> to vector<128xf32>
    %104 = vector.shape_cast %103 : vector<128xf32> to vector<1x128xf32>
    %105 = arith.addf %100, %104 : vector<1x128xf32>
    %c0_86 = arith.constant 0 : index
    %c0_87 = arith.constant 0 : index
    %c2_88 = arith.constant 2 : index
    %c0_89 = arith.constant 0 : index
    %c0_90 = arith.constant 0 : index
    %106 = vector.load %arg5[%c0_86, %c0_87, %c2_88, %c0_89, %c0_90] : memref<1x1x4x1x128xf32, #tpu.memory_space<vmem>>, vector<1x1x1x1x128xf32>
    %107 = vector.shape_cast %106 : vector<1x1x1x1x128xf32> to vector<1x128xf32>
    %108 = vector.shape_cast %105 : vector<1x128xf32> to vector<1x1x1x1x128xf32>
    tpu.vector_store %arg5[%c0_86, %c0_87, %c2_88, %c0_89, %c0_90], %108 {strides = array<i32>} : memref<1x1x4x1x128xf32, #tpu.memory_space<vmem>>, vector<1x1x1x1x128xf32>,
    %c0_91 = arith.constant 0 : index
    %c0_92 = arith.constant 0 : index
    %c2_93 = arith.constant 2 : index
    %c0_94 = arith.constant 0 : index
    %c0_95 = arith.constant 0 : index
    %109 = vector.load %arg6[%c0_91, %c0_92, %c2_93, %c0_94, %c0_95] : memref<1x1x4x1x128xf32, #tpu.memory_space<vmem>>, vector<1x1x1x1x128xf32>
    %110 = vector.shape_cast %109 : vector<1x1x1x1x128xf32> to vector<1x128xf32>
    %cst_96 = arith.constant dense<0.000000e+00> : vector<128xf32>
    %111 = vector.multi_reduction <add>, %96, %cst_96 [0] : vector<2x128xf32> to vector<128xf32>
    %112 = vector.shape_cast %111 : vector<128xf32> to vector<1x128xf32>
    %113 = arith.addf %110, %112 : vector<1x128xf32>
    %c0_97 = arith.constant 0 : index
    %c0_98 = arith.constant 0 : index
    %c2_99 = arith.constant 2 : index
    %c0_100 = arith.constant 0 : index
    %c0_101 = arith.constant 0 : index
    %114 = vector.load %arg6[%c0_97, %c0_98, %c2_99, %c0_100, %c0_101] : memref<1x1x4x1x128xf32, #tpu.memory_space<vmem>>, vector<1x1x1x1x128xf32>
    %115 = vector.shape_cast %114 : vector<1x1x1x1x128xf32> to vector<1x128xf32>
    %116 = vector.shape_cast %113 : vector<1x128xf32> to vector<1x1x1x1x128xf32>
    tpu.vector_store %arg6[%c0_97, %c0_98, %c2_99, %c0_100, %c0_101], %116 {strides = array<i32>} : memref<1x1x4x1x128xf32, #tpu.memory_space<vmem>>, vector<1x1x1x1x128xf32>,
    %c0_102 = arith.constant 0 : index
    %c0_103 = arith.constant 0 : index
    %c2_104 = arith.constant 2 : index
    %c0_105 = arith.constant 0 : index
    %c0_106 = arith.constant 0 : index
    %117 = vector.load %arg7[%c0_102, %c0_103, %c2_104, %c0_105, %c0_106] : memref<1x1x4x1x128xf32, #tpu.memory_space<vmem>>, vector<1x1x1x1x128xf32>
    %118 = vector.shape_cast %117 : vector<1x1x1x1x128xf32> to vector<1x128xf32>
    %119 = arith.extui %98 : vector<2x128xi1> to vector<2x128xi32>
    %120 = arith.sitofp %119 : vector<2x128xi32> to vector<2x128xf32>
    %cst_107 = arith.constant dense<0.000000e+00> : vector<128xf32>
    %121 = vector.multi_reduction <add>, %120, %cst_107 [0] : vector<2x128xf32> to vector<128xf32>
    %122 = vector.shape_cast %121 : vector<128xf32> to vector<1x128xf32>
    %123 = arith.addf %118, %122 : vector<1x128xf32>
    %c0_108 = arith.constant 0 : index
    %c0_109 = arith.constant 0 : index
    %c2_110 = arith.constant 2 : index
    %c0_111 = arith.constant 0 : index
    %c0_112 = arith.constant 0 : index
    %124 = vector.load %arg7[%c0_108, %c0_109, %c2_110, %c0_111, %c0_112] : memref<1x1x4x1x128xf32, #tpu.memory_space<vmem>>, vector<1x1x1x1x128xf32>
    %125 = vector.shape_cast %124 : vector<1x1x1x1x128xf32> to vector<1x128xf32>
    %126 = vector.shape_cast %123 : vector<1x128xf32> to vector<1x1x1x1x128xf32>
    tpu.vector_store %arg7[%c0_108, %c0_109, %c2_110, %c0_111, %c0_112], %126 {strides = array<i32>} : memref<1x1x4x1x128xf32, #tpu.memory_space<vmem>>, vector<1x1x1x1x128xf32>,
    %127 = vector.extract_strided_slice %4 {offsets = [2, 0, 0], sizes = [1, 2, 128], strides = [1, 1, 1]} : vector<4x2x128xf32> to vector<1x2x128xf32>
    %128 = vector.shape_cast %127 : vector<1x2x128xf32> to vector<2x128xf32>
    %cst_113 = arith.constant 0.000000e+00 : f32
    %129 = vector.broadcast %cst_113 : f32 to vector<2x128xf32>
    %130 = arith.select %98, %128, %129 : vector<2x128xi1>, vector<2x128xf32>
    %131 = arith.addf %93, %130 : vector<2x128xf32>
    %132 = vector.extract_strided_slice %12 {offsets = [3, 0, 0], sizes = [1, 2, 128], strides = [1, 1, 1]} : vector<4x2x128xf32> to vector<1x2x128xf32>
    %133 = vector.shape_cast %132 : vector<1x2x128xf32> to vector<2x128xf32>
    %134 = arith.mulf %133, %14 : vector<2x128xf32>
    %c3_i32 = arith.constant 3 : i32
    %135 = vector.broadcast %c3_i32 : i32 to vector<2x128xi32>
    %136 = arith.cmpi eq, %7, %135 : vector<2x128xi32>
    %c0_114 = arith.constant 0 : index
    %c0_115 = arith.constant 0 : index
    %c3 = arith.constant 3 : index
    %c0_116 = arith.constant 0 : index
    %c0_117 = arith.constant 0 : index
    %137 = vector.load %arg5[%c0_114, %c0_115, %c3, %c0_116, %c0_117] : memref<1x1x4x1x128xf32, #tpu.memory_space<vmem>>, vector<1x1x1x1x128xf32>
    %138 = vector.shape_cast %137 : vector<1x1x1x1x128xf32> to vector<1x128xf32>
    %cst_118 = arith.constant 0.000000e+00 : f32
    %139 = vector.broadcast %cst_118 : f32 to vector<2x128xf32>
    %140 = arith.select %136, %134, %139 : vector<2x128xi1>, vector<2x128xf32>
    %cst_119 = arith.constant dense<0.000000e+00> : vector<128xf32>
    %141 = vector.multi_reduction <add>, %140, %cst_119 [0] : vector<2x128xf32> to vector<128xf32>
    %142 = vector.shape_cast %141 : vector<128xf32> to vector<1x128xf32>
    %143 = arith.addf %138, %142 : vector<1x128xf32>
    %c0_120 = arith.constant 0 : index
    %c0_121 = arith.constant 0 : index
    %c3_122 = arith.constant 3 : index
    %c0_123 = arith.constant 0 : index
    %c0_124 = arith.constant 0 : index
    %144 = vector.load %arg5[%c0_120, %c0_121, %c3_122, %c0_123, %c0_124] : memref<1x1x4x1x128xf32, #tpu.memory_space<vmem>>, vector<1x1x1x1x128xf32>
    %145 = vector.shape_cast %144 : vector<1x1x1x1x128xf32> to vector<1x128xf32>
    %146 = vector.shape_cast %143 : vector<1x128xf32> to vector<1x1x1x1x128xf32>
    tpu.vector_store %arg5[%c0_120, %c0_121, %c3_122, %c0_123, %c0_124], %146 {strides = array<i32>} : memref<1x1x4x1x128xf32, #tpu.memory_space<vmem>>, vector<1x1x1x1x128xf32>,
    %c0_125 = arith.constant 0 : index
    %c0_126 = arith.constant 0 : index
    %c3_127 = arith.constant 3 : index
    %c0_128 = arith.constant 0 : index
    %c0_129 = arith.constant 0 : index
    %147 = vector.load %arg6[%c0_125, %c0_126, %c3_127, %c0_128, %c0_129] : memref<1x1x4x1x128xf32, #tpu.memory_space<vmem>>, vector<1x1x1x1x128xf32>
    %148 = vector.shape_cast %147 : vector<1x1x1x1x128xf32> to vector<1x128xf32>
    %cst_130 = arith.constant dense<0.000000e+00> : vector<128xf32>
    %149 = vector.multi_reduction <add>, %134, %cst_130 [0] : vector<2x128xf32> to vector<128xf32>
    %150 = vector.shape_cast %149 : vector<128xf32> to vector<1x128xf32>
    %151 = arith.addf %148, %150 : vector<1x128xf32>
    %c0_131 = arith.constant 0 : index
    %c0_132 = arith.constant 0 : index
    %c3_133 = arith.constant 3 : index
    %c0_134 = arith.constant 0 : index
    %c0_135 = arith.constant 0 : index
    %152 = vector.load %arg6[%c0_131, %c0_132, %c3_133, %c0_134, %c0_135] : memref<1x1x4x1x128xf32, #tpu.memory_space<vmem>>, vector<1x1x1x1x128xf32>
    %153 = vector.shape_cast %152 : vector<1x1x1x1x128xf32> to vector<1x128xf32>
    %154 = vector.shape_cast %151 : vector<1x128xf32> to vector<1x1x1x1x128xf32>
    tpu.vector_store %arg6[%c0_131, %c0_132, %c3_133, %c0_134, %c0_135], %154 {strides = array<i32>} : memref<1x1x4x1x128xf32, #tpu.memory_space<vmem>>, vector<1x1x1x1x128xf32>,
    %c0_136 = arith.constant 0 : index
    %c0_137 = arith.constant 0 : index
    %c3_138 = arith.constant 3 : index
    %c0_139 = arith.constant 0 : index
    %c0_140 = arith.constant 0 : index
    %155 = vector.load %arg7[%c0_136, %c0_137, %c3_138, %c0_139, %c0_140] : memref<1x1x4x1x128xf32, #tpu.memory_space<vmem>>, vector<1x1x1x1x128xf32>
    %156 = vector.shape_cast %155 : vector<1x1x1x1x128xf32> to vector<1x128xf32>
    %157 = arith.extui %136 : vector<2x128xi1> to vector<2x128xi32>
    %158 = arith.sitofp %157 : vector<2x128xi32> to vector<2x128xf32>
    %cst_141 = arith.constant dense<0.000000e+00> : vector<128xf32>
    %159 = vector.multi_reduction <add>, %158, %cst_141 [0] : vector<2x128xf32> to vector<128xf32>
    %160 = vector.shape_cast %159 : vector<128xf32> to vector<1x128xf32>
    %161 = arith.addf %156, %160 : vector<1x128xf32>
    %c0_142 = arith.constant 0 : index
    %c0_143 = arith.constant 0 : index
    %c3_144 = arith.constant 3 : index
    %c0_145 = arith.constant 0 : index
    %c0_146 = arith.constant 0 : index
    %162 = vector.load %arg7[%c0_142, %c0_143, %c3_144, %c0_145, %c0_146] : memref<1x1x4x1x128xf32, #tpu.memory_space<vmem>>, vector<1x1x1x1x128xf32>
    %163 = vector.shape_cast %162 : vector<1x1x1x1x128xf32> to vector<1x128xf32>
    %164 = vector.shape_cast %161 : vector<1x128xf32> to vector<1x1x1x1x128xf32>
    tpu.vector_store %arg7[%c0_142, %c0_143, %c3_144, %c0_145, %c0_146], %164 {strides = array<i32>} : memref<1x1x4x1x128xf32, #tpu.memory_space<vmem>>, vector<1x1x1x1x128xf32>,
    %165 = vector.extract_strided_slice %4 {offsets = [3, 0, 0], sizes = [1, 2, 128], strides = [1, 1, 1]} : vector<4x2x128xf32> to vector<1x2x128xf32>
    %166 = vector.shape_cast %165 : vector<1x2x128xf32> to vector<2x128xf32>
    %cst_147 = arith.constant 0.000000e+00 : f32
    %167 = vector.broadcast %cst_147 : f32 to vector<2x128xf32>
    %168 = arith.select %136, %166, %167 : vector<2x128xi1>, vector<2x128xf32>
    %169 = arith.addf %131, %168 : vector<2x128xf32>
    %170 = arith.subf %16, %169 : vector<2x128xf32>
    %c0_148 = arith.constant 0 : index
    %c0_149 = arith.constant 0 : index
    %c0_150 = arith.constant 0 : index
    %c0_151 = arith.constant 0 : index
    %171 = vector.load %arg8[%c0_148, %c0_149, %c0_150, %c0_151] : memref<1x1x1x128xf32, #tpu.memory_space<vmem>>, vector<1x1x1x128xf32>
    %172 = vector.shape_cast %171 : vector<1x1x1x128xf32> to vector<1x128xf32>
    %cst_152 = arith.constant dense<0.000000e+00> : vector<128xf32>
    %173 = vector.multi_reduction <add>, %170, %cst_152 [0] : vector<2x128xf32> to vector<128xf32>
    %174 = vector.shape_cast %173 : vector<128xf32> to vector<1x128xf32>
    %175 = arith.addf %172, %174 : vector<1x128xf32>
    %c0_153 = arith.constant 0 : index
    %c0_154 = arith.constant 0 : index
    %c0_155 = arith.constant 0 : index
    %c0_156 = arith.constant 0 : index
    %176 = vector.load %arg8[%c0_153, %c0_154, %c0_155, %c0_156] : memref<1x1x1x128xf32, #tpu.memory_space<vmem>>, vector<1x1x1x128xf32>
    %177 = vector.shape_cast %176 : vector<1x1x1x128xf32> to vector<1x128xf32>
    %178 = vector.shape_cast %175 : vector<1x128xf32> to vector<1x1x1x128xf32>
    tpu.vector_store %arg8[%c0_153, %c0_154, %c0_155, %c0_156], %178 {strides = array<i32>} : memref<1x1x1x128xf32, #tpu.memory_space<vmem>>, vector<1x1x1x128xf32>,
    return
  }
  func.func @transform_0(%arg0: i32, %arg1: i32, %arg2: i32) -> (i32, i32, i32, i32) {
    %c1_i32 = arith.constant 1 : i32
    %0 = arith.muli %arg1, %c1_i32 : i32
    %1 = arith.addi %0, %arg2 : i32
    %c0_i32 = arith.constant 0 : i32
    %c0_i32_0 = arith.constant 0 : i32
    %c0_i32_1 = arith.constant 0 : i32
    return %arg0, %c0_i32, %1, %c0_i32_0 : i32, i32, i32, i32
  }
  func.func @transform_1(%arg0: i32, %arg1: i32, %arg2: i32) -> (i32, i32, i32, i32) {
    %c1_i32 = arith.constant 1 : i32
    %0 = arith.muli %arg1, %c1_i32 : i32
    %1 = arith.addi %0, %arg2 : i32
    %c0_i32 = arith.constant 0 : i32
    %c0_i32_0 = arith.constant 0 : i32
    %c0_i32_1 = arith.constant 0 : i32
    return %arg0, %c0_i32, %1, %c0_i32_0 : i32, i32, i32, i32
  }
  func.func @transform_2(%arg0: i32, %arg1: i32, %arg2: i32) -> (i32, i32, i32, i32, i32) {
    %c0_i32 = arith.constant 0 : i32
    %c0_i32_0 = arith.constant 0 : i32
    %c0_i32_1 = arith.constant 0 : i32
    %c0_i32_2 = arith.constant 0 : i32
    return %arg0, %arg1, %c0_i32, %c0_i32_0, %c0_i32_1 : i32, i32, i32, i32, i32
  }
  func.func @transform_3(%arg0: i32, %arg1: i32, %arg2: i32) -> (i32, i32, i32, i32, i32) {
    %c0_i32 = arith.constant 0 : i32
    %c0_i32_0 = arith.constant 0 : i32
    %c0_i32_1 = arith.constant 0 : i32
    %c0_i32_2 = arith.constant 0 : i32
    return %arg0, %arg1, %c0_i32, %c0_i32_0, %c0_i32_1 : i32, i32, i32, i32, i32
  }
  func.func @transform_4(%arg0: i32, %arg1: i32, %arg2: i32) -> (i32, i32, i32, i32, i32) {
    %c0_i32 = arith.constant 0 : i32
    %c0_i32_0 = arith.constant 0 : i32
    %c0_i32_1 = arith.constant 0 : i32
    %c0_i32_2 = arith.constant 0 : i32
    return %arg0, %arg1, %c0_i32, %c0_i32_0, %c0_i32_1 : i32, i32, i32, i32, i32
  }
  func.func @transform_5(%arg0: i32, %arg1: i32, %arg2: i32) -> (i32, i32, i32, i32) {
    %c0_i32 = arith.constant 0 : i32
    %c0_i32_0 = arith.constant 0 : i32
    %c0_i32_1 = arith.constant 0 : i32
    return %arg0, %arg1, %c0_i32, %c0_i32_0 : i32, i32, i32, i32
  }
}

</mosaic_0001>

<bundles_post_ra>
// kernel: tpu_custom_call.1
= control target key start
LH: loop header
LB: loop body
LE: loop exit
PB: predicated region body
PF: predicated region fallthrough
CT: control target
= control target key end

     0   :  { %s1715_s0 = inlined_call_operand.hbm [shape: f32[2,4,2,128], index: 0, kind: input, shape index: {}]   ;;  %s1716_s1 = inlined_call_operand.hbm [shape: f32[2,1,2,128], index: 1, kind: input, shape index: {}]   ;;  %s1717_s2 = inlined_call_operand.hbm [shape: f32[2,1,4,1,128], index: 2, kind: output, shape index: {0}]   ;;  %s1718_s3 = inlined_call_operand.hbm [shape: f32[2,1,4,1,128], index: 3, kind: output, shape index: {1}]   ;;  %s1719_s4 = inlined_call_operand.hbm [shape: f32[2,1,4,1,128], index: 4, kind: output, shape index: {2}]   ;;  %s1720_s5 = inlined_call_operand.hbm [shape: f32[2,1,1,128], index: 5, kind: output, shape index: {3}]  }
   0x1   :  { %1724 = sst [smem:[#allocation21_spill]] %s1715_s0 }
   0x2   :  { %1725 = sst [smem:[#allocation22_spill]] %s1716_s1 }
   0x3   :  { %11 = vsyncpa [#allocation3], 0 }
   0x4   :  { %13 = vsyncpa [#allocation3 + $0x1], 0 }
   0x5   :  { %14 = vsyncpa [#allocation6], 0 }
   0x6   :  { %16 = vsyncpa [#allocation6 + $0x1], 0 }
   0x7   :  { %17 = vsyncpa [#allocation4], 0 }
   0x8   :  { %19 = vsyncpa [#allocation4 + $0x1], 0 }
   0x9   :  { %20 = vsyncpa [#allocation9], 0 }
   0xa   :  { %22 = vsyncpa [#allocation9 + $0x1], 0 }
   0xb   :  { %23 = vsyncpa [#allocation12], 0 }
   0xc   :  { %25 = vsyncpa [#allocation12 + $0x1], 0  ;;  %s1303_s18 = smov 0   ;;  %s1305_s19 = smov 0  }
   0xd   :  { %s1307_s20 = smov 0   ;;  %s1309_s21 = smov 0  }
   0xe   :  { %s1311_s22 = smov 0   ;;  %s1313_s23 = smov 0  }
   0xf LB: > { %1726 = sst [smem:[#allocation18_spill]] %s1262_s22  ;;  %s1334_s24 = sadd.s32 4294967295, %s1266_s23   ;;  %s1266_s23 = sphi %s1313_s23, %s31_s23   ;;  %s1262_s22 = sphi %s1311_s22, %s1740_s22   ;;  %s1258_s21 = sphi %s1309_s21, %s1739_s21   ;;  %s1254_s20 = sphi %s1307_s20, %s1743_s20   ;;  %s1250_s19 = sphi %s1305_s19, %s1742_s19   ;;  %s1246_s18 = sphi %s1303_s18, %s1741_s18  }
  0x10   : > { %s1721_s25 = sadd.s32 4294967294, %s1266_s23   ;;  %s50_s26 = sadd.s32 1, %s1262_s22 }
  0x11   : > { %s61_s27 = sadd.s32 1, %s1254_s20  ;;  %p52_p0 = scmp.ge.s32.totalorder %s50_s26, 2 }
  0x12   : > { %p68_p1 = scmp.ne.s32.totalorder %s1254_s20, %s1250_s19  ;;  %p69_p2 = scmp.eq.s32.totalorder %s1266_s23, 0 }
  0x13   : > { %p74_p3 = scmp.ne.s32.totalorder %s1250_s19, %s1246_s18  ;;  %s1745_s26 = smov (%p52_p0, %s50_s26), 0 }
  0x14   : > { %1727 = sst [smem:[#allocation19_spill]] %s1745_s26  ;;  %p1346_p4 = por %p69_p2, %p68_p1 }
  0x15   : > { %p75_p5 = scmp.eq.s32.totalorder %s1334_s24, 0  ;;  %s56_s29 = ssub.s32 %s1262_s22, %s1745_s26 }
  0x16   : > { %p130_p6 = scmp.eq.s32.totalorder %s1334_s24, 1  ;;  %p59_p7 = scmp.eq.s32.totalorder %s56_s29, 0 }
  0x17   : > { %p1354_p8 = por %p75_p5, %p74_p3  ;;  %p136_p10 = scmp.eq.s32.totalorder %s1721_s25, 1 }
  0x18   : > { %p1358_p9 = por %p130_p6, %p68_p1  ;;  %p881_p12 = scmp.ge.s32.totalorder %s1266_s23, 2 }
  0x19   : > { %s1365_s7 = scalar_select %p59_p7, %s1254_s20, %s61_s27  }
  0x1a   : > { %p1367_p11 = por %p136_p10, %p74_p3  ;;  %p961_p13 = scmp.lt.s32.totalorder %s1266_s23, 2 }
  0x1b   : > { %1731 = sst [smem:[#allocation20_spill]] %s1365_s7  ;;  %s240_s9 = sand.u32 1, %s1254_s20  }
  0x1c   : > { %s882_s10 = sshll.u32 %s240_s9, 3  ;;  %s923_s11 = sshll.u32 %s1262_s22, 3 }
  0x1d   : > { %s1733_s0 = sld [smem:[#allocation21_spill]]  ;;  %s244_s15 = scalar_lea.vmem [#allocation2], %s882_s10 }
  0x1e   : > { %s254_s16 = sshll.u32 %s244_s15, 4  ;;  %p1380_p0 = pnand %p961_p13, %p1346_p4  ;;  %s255_s16 = int_to_ptr.vmem [resolvable:$true] %s254_s16 }
  0x1f   : > { %p887_p1 = scmp.ge.s32.totalorder %s1266_s23, 1  ;;  %s241_s29 = scalar_lea.sflag [#allocation3], %s240_s9 }
  0x20   : > { %s1268_s25 = smov 32   ;;  %s1269_s26 = smov 2  }
  0x21   : > { %p283_p2 = scmp.lt.s32.totalorder %s1266_s23, 3  ;;  %s886_s10 = sshll.u32 %s1262_s22, 1 }
  0x22   : > { %s1735_s1 = sld [smem:[#allocation22_spill]]  ;;  %s265_s7 = scalar_lea.sflag [#allocation6], %s240_s9 }
  0x23   : > { %s251_s14 = scalar_lea.hbm %s1733_s0, %s923_s11  ;;  %s885_s11 = sshll.u32 %s240_s9, 1 }
  0x24   : > { %s252_s17 = sshll.u32 %s251_s14, 4  ;;  %p284_p3 = pnand %p887_p1, %p283_p2  ;;  %s253_s17 = int_to_ptr.hbm [resolvable:$true] %s252_s17 }
  0x25   : > { %944 = dma.hbm_to_vmem [thread:$0]  (!%p1380_p0), %s253_s17, 128, %s255_s16, %s241_s29, %s1268_s25, %s1268_s25, %s1269_s26  }
  0x26   : > { %s268_s14 = scalar_lea.vmem [#allocation5], %s885_s11  ;;  %287 = sbr.rel (%p284_p3) target bundleno = 156 (0x9c), region = 28 }
  0x27   : > { %s278_s15 = sshll.u32 %s268_s14, 4  ;;  %s1395_s25 = sand.u32 (!%p284_p3), 1, %s1250_s19   ;;  %s279_s15 = int_to_ptr.vmem [resolvable:$true] %s278_s15 }
  0x28   : > { %s274_s28 = scalar_lea.hbm %s1735_s1, %s886_s10  ;;  %s888_s26 = sshll.u32 (!%p284_p3), %s1395_s25, 3 }
  0x29   : > { %s276_s0 = sshll.u32 %s274_s28, 4  ;;  %s290_s16 = scalar_lea.sflag (!%p284_p3), [#allocation3], %s1395_s25  ;;  %s277_s0 = int_to_ptr.hbm [resolvable:$true] %s276_s0 }
  0x2a   : > { %947 = dma.hbm_to_vmem [thread:$0]  (!%p1380_p0), %s277_s0, 32, %s279_s15, %s265_s7  }
  0x2b   : > { %s293_s17 = scalar_lea.vmem [#allocation2], %s888_s26 }
  0x2c   : > { %1225 = dma.done.wait (%p1354_p8), %s290_s16, 128  }
  0x2d   : > { %1227 = vsyncadd (%p1354_p8), %s290_s16, 4294967168  ;;  %s889_s9 = sshll.u32 %s1395_s25, 1  ;;  %s300_s0 = scalar_lea.sflag [#allocation6], %s1395_s25 }
  0x2e   : > { %s303_s7 = scalar_lea.vmem [#allocation5], %s889_s9 }
  0x2f   : > { %1229 = dma.done.wait (%p1354_p8), %s300_s0, 32  }
  0x30   : > { %1231 = vsyncadd (%p1354_p8), %s300_s0, 4294967264  ;;  %s890_s27 = sshll.u32 %s1395_s25, 2  ;;  %s1411_s29 = scalar_lea.vmem [#allocation11], %s1395_s25  ;;  %v1270_v0 = vmov 0.0   ;;  %vm375_vm0 = vcmask 1041408  }
  0x31   : > { %368 = vst [vmem:[%s1411_s29] sm:$0x1] %v1270_v0  ;;  %s1415_s11 = scalar_lea.vmem [#allocation8], %s890_s27  ;;  %s1425_s30 = scalar_lea.vmem [#allocation7], %s890_s27  ;;  %v369_v1 = vld [vmem:[%s293_s17] sm:$0x3] }
  0x32   : > { %360 = vst [vmem:[%s1415_s11] sm:$0x1] %v1270_v0  ;;  %v1431_v2 = vld [vmem:[%s293_s17 + $0x2] sm:$0x3]  ;;  %v1435_v3 = vld [vmem:[%s293_s17 + $0x4] sm:$0x3]  ;;  %v376_v5 = vsel %vm375_vm0, %v369_v1, -inf }
  0x33   : > { %361 = vst [vmem:[%s1415_s11 + $0x1] sm:$0x1] %v1270_v0  ;;  %v1437_v4 = vld [vmem:[%s293_s17 + $0x6] sm:$0x3]  ;;  %v377_v6 = vsel %vm375_vm0, %v1431_v2, -inf  ;;  %v378_v7 = vsel %vm375_vm0, %v1435_v3, -inf }
  0x34   : > { %362 = vst [vmem:[%s1415_s11 + $0x2] sm:$0x1] %v1270_v0  ;;  %v379_v8 = vsel %vm375_vm0, %v1437_v4, -inf  ;;  %s1448_s10 = scalar_lea.vmem [#allocation10], %s890_s27  ;;  %v380_v9 = vmax.f32 %v376_v5, %v377_v6  ;;  %v373_v11 = vld [vmem:[%s303_s7] sm:$0x3] }
  0x35   : > { %363 = vst [vmem:[%s1415_s11 + $0x3] sm:$0x1] %v1270_v0  ;;  %v381_v10 = vmax.f32 %v378_v7, %v379_v8  ;;  %v925_v13 = vceil.f32 %v373_v11  ;;  %v926_v14 = vfloor.f32 %v373_v11  ;;  %vm924_vm1 = vcmp.lt.s32.totalorder %v373_v11, 0  ;;  %s592_s12 = sand.u32 1, %s1334_s24   ;;  %s1550_s13 = sshll.u32 %s1258_s21, 2 }
  0x36   : > { %356 = vst [vmem:[%s1425_s30] sm:$0x1] %v1270_v0  ;;  %s632_s15 = scalar_lea.hbm %s1718_s3, %s1550_s13  ;;  %s633_s26 = sshll.u32 %s1415_s11, 4  ;;  %s1577_s26 = int_to_ptr.vmem [resolvable:$true] %s633_s26 }
  0x37   : > { %357 = vst [vmem:[%s1425_s30 + $0x1] sm:$0x1] %v1270_v0  ;;  %v1456_v12 = vmax.f32 %v380_v9, %v381_v10  ;;  %v927_v22 = vsel %vm924_vm1, %v925_v13, %v926_v14  ;;  %s1561_s16 = sshll.u32 %s632_s15, 4  ;;  %s650_s0 = scalar_lea.hbm %s1719_s4, %s1550_s13  ;;  %s636_s16 = int_to_ptr.hbm [resolvable:$true] %s1561_s16 }
  0x38   : > { %358 = vst [vmem:[%s1425_s30 + $0x2] sm:$0x1] %v1270_v0  ;;  %v1467_v24 = vcvt.f32.s32 %v927_v22  ;;  %s615_s7 = sshll.u32 %s1425_s30, 4  ;;  %s614_s14 = scalar_lea.hbm %s1717_s2, %s1550_s13  ;;  %s1593_s7 = int_to_ptr.vmem [resolvable:$true] %s615_s7 }
  0x39   : > { %359 = vst [vmem:[%s1425_s30 + $0x3] sm:$0x1] %v1270_v0  ;;  %v383_v15 = vsub.f32 %v369_v1, %v1456_v12  ;;  %v384_v16 = vsub.f32 %v1431_v2, %v1456_v12  ;;  %v385_v17 = vsub.f32 %v1435_v3, %v1456_v12  ;;  %v386_v18 = vsub.f32 %v1437_v4, %v1456_v12  ;;  %s1582_s15 = sshll.u32 %s650_s0, 4  ;;  %s1590_s27 = sshll.u32 %s614_s14, 4  ;;  %s618_s27 = int_to_ptr.hbm [resolvable:$true] %s1590_s27  ;;  %s654_s15 = int_to_ptr.hbm [resolvable:$true] %s1582_s15 }
  0x3a   : > { %364 = vst [vmem:[%s1448_s10] sm:$0x1] %v1270_v0  ;;  %vm420_vm2 = vcmp.eq.s32.totalorder %v1467_v24, 0  ;;  %vm457_vm3 = vcmp.eq.s32.totalorder %v1467_v24, 1  ;;  %vm497_vm4 = vcmp.eq.s32.totalorder %v1467_v24, 2  ;;  %vm537_vm5 = vcmp.eq.s32.totalorder %v1467_v24, 3  ;;  %s651_s28 = sshll.u32 %s1448_s10, 4  ;;  %s1633_s28 = int_to_ptr.vmem [resolvable:$true] %s651_s28 }
  0x3b   : > { %365 = vst [vmem:[%s1448_s10 + $0x1] sm:$0x1] %v1270_v0  ;;  %v387_v19 = vmul.f32 1.442695, %v383_v15  ;;  %v389_v20 = vmul.f32 1.442695, %v384_v16 }
  0x3c   : > { %366 = vst [vmem:[%s1448_s10 + $0x2] sm:$0x1] %v1270_v0  ;;  %v391_v21 = vmul.f32 1.442695, %v385_v17  ;;  %v393_v23 = vmul.f32 1.442695, %v386_v18 }
  0x3d   : > { %367 = vst [vmem:[%s1448_s10 + $0x3] sm:$0x1] %v1270_v0  ;;  %1016 = vpow2.f32 %v387_v19  ;;  %v893_v26 = vsel %vm420_vm2, 1.0, %v1270_v0  ;;  %v899_v30 = vsel %vm457_vm3, 1.0, %v1270_v0  ;;  %v906_v35 = vsel %vm497_vm4, 1.0, %v1270_v0  ;;  %s1598_s0 = scalar_lea.sflag [#allocation9], %s592_s12 }
  0x3e   : > { %1018 = vpow2.f32 %v389_v20  ;;  %v445_v29 = vsel %vm375_vm0, %v893_v26, 0.0  ;;  %v485_v34 = vsel %vm375_vm0, %v899_v30, 0.0  ;;  %v525_v40 = vsel %vm375_vm0, %v906_v35, 0.0  ;;  %s1102_s13 = sshra.s32 %s636_s16, 4  ;;  %s1108_s9 = scalar_lea.hbm %s1718_s3, 8  ;;  %s1103_s13 = int_to_ptr.hbm [resolvable:$true] %s1102_s13 }
  0x3f   : > { %1020 = vpow2.f32 %v391_v21  ;;  %v446_v33 = vrot.slane %v445_v29, 4  ;;  %v486_v39 = vrot.slane %v485_v34, 4  ;;  %v526_v43 = vrot.slane %v525_v40, 4  ;;  %s1104_s17 = scalar_lea.hbm %s1103_s13, 4  ;;  %p1109_p7 = scmp.lt.s32.totalorder %s1103_s13, %s1718_s3 }
  0x40   : > { %1022 = vpow2.f32 %v393_v23  ;;  %v913_v44 = vsel %vm537_vm5, 1.0, %v1270_v0  ;;  %v454_v46 = vsel %vm420_vm2, %v369_v1, 0.0  ;;  %v494_v50 = vsel %vm457_vm3, %v1431_v2, 0.0  ;;  %p1105_p4 = scmp.ne.s32.totalorder %s1103_s13, %s1104_s17  ;;  %p1110_p8 = scmp.lt.s32.totalorder %s1108_s9, %s1104_s17 }
  0x41   : > { %v447_v42 = vadd.f32 %v446_v33, %v445_v29  ;;  %v487_v47 = vadd.f32 %v486_v39, %v485_v34  ;;  %v565_v48 = vsel %vm375_vm0, %v913_v44, 0.0  ;;  %v527_v51 = vadd.f32 %v526_v43, %v525_v40  ;;  %v442_v6 = vld [vmem:[%s1448_s10] sm:$0x1] }
  0x42   : > { %v566_v52 = vrot.slane %v565_v48, 4  ;;  %v495_v58 = vadd.f32 %v494_v50, %v454_v46  ;;  %v534_v59 = vsel %vm497_vm4, %v1435_v3, 0.0  ;;  %v574_v8 = vsel %vm537_vm5, %v1437_v4, 0.0  ;;  %v898_v3 = vld [vmem:[%s1448_s10 + $0x1] sm:$0x1]  ;;  %p1106_p5 = pnand %p1105_p4, %p1358_p9  ;;  %p1111_p10 = por %p1110_p8, %p1109_p7 }
  0x43   : > { %v1470_v25 = vpop.eup %1016  ;;  %v448_v49 = vrot.slane %v447_v42, 2  ;;  %v488_v54 = vrot.slane %v487_v47, 2  ;;  %v528_v56 = vrot.slane %v527_v51, 2  ;;  %v905_v15 = vld [vmem:[%s1448_s10 + $0x2] sm:$0x1] }
  0x44   : > { %v1477_v27 = vpop.eup %1018  ;;  %v395_v28 = vsel %vm375_vm0, %v1470_v25, 0.0  ;;  %v567_v57 = vadd.f32 %v566_v52, %v565_v48  ;;  %v535_v7 = vadd.f32 %v534_v59, %v495_v58  ;;  %v912_v19 = vld [vmem:[%s1448_s10 + $0x3] sm:$0x1]  ;;  %p1107_p6 = pneg %p1106_p5 }
  0x45   : > { %v1486_v31 = vpop.eup %1020  ;;  %v396_v32 = vsel %vm375_vm0, %v1477_v27, 0.0  ;;  %v449_v55 = vadd.f32 %v448_v49, %v447_v42  ;;  %v489_v61 = vadd.f32 %v488_v54, %v487_v47  ;;  %v529_v62 = vadd.f32 %v528_v56, %v527_v51 }
  0x46   : > { %v1494_v36 = vpop.eup %1022  ;;  %v397_v37 = vadd.f32 %v396_v32, %v395_v28  ;;  %v398_v38 = vsel %vm375_vm0, %v1486_v31, 0.0  ;;  %v568_v63 = vrot.slane %v567_v57, 2  ;;  %v575_v4 = vadd.f32 %v574_v8, %v535_v7  ;;  %p1112_p13 = pnand %p1111_p10, %p1107_p6 }
  0x47   : > { %v400_v41 = vsel %vm375_vm0, %v1494_v36, 0.0  ;;  %v450_v60 = vrot.slane %v449_v55, 1  ;;  %v490_v1 = vrot.slane %v489_v61, 1  ;;  %v530_v2 = vrot.slane %v529_v62, 1 }
  0x48   : > { %v399_v45 = vadd.f32 %v398_v38, %v397_v37  ;;  %v569_v5 = vadd.f32 %v568_v63, %v567_v57 }
  0x49   : > { %v451_v0 = vadd.f32 %v450_v60, %v449_v55  ;;  %v491_v10 = vadd.f32 %v490_v1, %v489_v61  ;;  %v531_v11 = vadd.f32 %v530_v2, %v529_v62 }
  0x4a   : > { %v401_v53 = vadd.f32 %v400_v41, %v399_v45  ;;  %v570_v13 = vrot.slane %v569_v5, 1 }
  0x4b   : > { %v452_v9 = vadd.f32 %v451_v0, %v442_v6  ;;  %v492_v17 = vadd.f32 %v898_v3, %v491_v10  ;;  %v532_v18 = vadd.f32 %v905_v15, %v531_v11  ;;  %v432_v3 = vld [vmem:[%s1415_s11] sm:$0x1]  ;;  %v896_v10 = vld [vmem:[%s1415_s11 + $0x1] sm:$0x1] }
  0x4c   : > { %1024 = vrcp.f32 %v401_v53  ;;  %v411_v21 = vand.u32 2147483647, %v401_v53  ;;  %v413_v22 = vand.u32 2147483648, %v401_v53  ;;  %v571_v23 = vadd.f32 %v570_v13, %v569_v5 }
  0x4d   : > { %1026 = vlog2.f32 %v401_v53  ;;  %453 = vst [vmem:[%s1448_s10] sm:$0x1] %v452_v9  ;;  %vm407_vm6 = vweird.f32 %v401_v53 }
  0x4e   : > { %900 = vst [vmem:[%s1448_s10 + $0x1] sm:$0x1] %v492_v17  ;;  %v572_v29 = vadd.f32 %v912_v19, %v571_v23  ;;  %v414_v33 = vor.u32 1.1754944e-38, %v413_v22  ;;  %vm412_vm9 = vcmp.eq.f32.partialorder %v411_v21, 8.507059e+37  ;;  %v910_v21 = vld [vmem:[%s1415_s11 + $0x3] sm:$0x1] }
  0x4f   : > { %907 = vst [vmem:[%s1448_s10 + $0x2] sm:$0x1] %v532_v18  ;;  %v903_v18 = vld [vmem:[%s1415_s11 + $0x2] sm:$0x1] }
  0x50   : > { %914 = vst [vmem:[%s1448_s10 + $0x3] sm:$0x1] %v572_v29 }
  0x52   : > { %v1025_v14 = vpop.eup %1024 }
  0x53   : > { %v403_v16 = vmul.f32 %v1025_v14, %v401_v53  ;;  %v1027_v20 = vpop.eup %1026  ;;  %vm408_vm7 = vweird.f32 %v1025_v14 }
  0x54   : > { %v417_v28 = vmul.f32 0.6931472, %v1027_v20  ;;  %vm409_vm8 = vmor %vm407_vm6, %vm408_vm7 }
  0x55   : > { %v404_v26 = vsub.f32 1.0, %v403_v16 }
  0x56   : > { %v418_v32 = vadd.f32 %v417_v28, %v1456_v12 }
  0x57   : > { %v405_v30 = vmul.f32 %v1025_v14, %v404_v26 }
  0x58   : > { %v576_v35 = vsub.f32 %v418_v32, %v575_v4 }
  0x59   : > { %v406_v34 = vadd.f32 %v1025_v14, %v405_v30 }
  0x5a   : > { %v578_v38 = vsel %vm375_vm0, %v576_v35, 0.0 }
  0x5b   : > { %v410_v37 = vsel %vm409_vm8, %v1025_v14, %v406_v34  ;;  %v579_v40 = vrot.slane %v578_v38, 4 }
  0x5c   : > { %v415_v39 = vsel %vm412_vm9, %v414_v33, %v410_v37 }
  0x5d   : > { %v419_v41 = vmul.f32 %v1470_v25, %v415_v39  ;;  %v456_v42 = vmul.f32 %v1477_v27, %v415_v39  ;;  %v496_v43 = vmul.f32 %v1486_v31, %v415_v39  ;;  %v536_v44 = vmul.f32 %v1494_v36, %v415_v39 }
  0x5e   : > { %v1530_v12 = vadd.f32 %v579_v40, %v578_v38 }
  0x5f   : > { %v433_v45 = vsel %vm375_vm0, %v419_v41, 0.0  ;;  %v472_v46 = vsel %vm375_vm0, %v456_v42, 0.0  ;;  %v512_v47 = vsel %vm375_vm0, %v496_v43, 0.0  ;;  %v552_v48 = vsel %vm375_vm0, %v536_v44, 0.0 }
  0x60   : > { %v434_v49 = vrot.slane %v433_v45, 4  ;;  %v473_v50 = vrot.slane %v472_v46, 4  ;;  %v513_v51 = vrot.slane %v512_v47, 4  ;;  %v553_v25 = vrot.slane %v552_v48, 4 }
  0x61   : > { %v422_v27 = vsel %vm420_vm2, %v419_v41, 0.0  ;;  %v460_v31 = vsel %vm457_vm3, %v456_v42, 0.0  ;;  %v500_v36 = vsel %vm497_vm4, %v496_v43, 0.0  ;;  %v540_v52 = vsel %vm537_vm5, %v536_v44, 0.0  ;;  %v421_v42 = vld [vmem:[%s1425_s30] sm:$0x1] }
  0x62   : > { %v435_v53 = vadd.f32 %v434_v49, %v433_v45  ;;  %v474_v54 = vadd.f32 %v473_v50, %v472_v46  ;;  %v514_v55 = vadd.f32 %v513_v51, %v512_v47  ;;  %v554_v56 = vadd.f32 %v553_v25, %v552_v48  ;;  %v894_v47 = vld [vmem:[%s1425_s30 + $0x1] sm:$0x1]  ;;  %v901_v48 = vld [vmem:[%s1425_s30 + $0x2] sm:$0x1] }
  0x63   : > { %v423_v57 = vsel %vm375_vm0, %v422_v27, 0.0  ;;  %v461_v58 = vsel %vm375_vm0, %v460_v31, 0.0  ;;  %v501_v59 = vsel %vm375_vm0, %v500_v36, 0.0  ;;  %v541_v60 = vsel %vm375_vm0, %v540_v52, 0.0  ;;  %v908_v27 = vld [vmem:[%s1425_s30 + $0x3] sm:$0x1] }
  0x64   : > { %v436_v61 = vrot.slane %v435_v53, 2  ;;  %v475_v62 = vrot.slane %v474_v54, 2  ;;  %v515_v63 = vrot.slane %v514_v55, 2  ;;  %v555_v24 = vrot.slane %v554_v56, 2 }
  0x65   : > { %v424_v0 = vrot.slane %v423_v57, 4  ;;  %v462_v1 = vrot.slane %v461_v58, 4  ;;  %v502_v2 = vrot.slane %v501_v59, 4  ;;  %v542_v5 = vrot.slane %v541_v60, 4 }
  0x66   : > { %v437_v6 = vadd.f32 %v436_v61, %v435_v53  ;;  %v476_v7 = vadd.f32 %v475_v62, %v474_v54  ;;  %v516_v8 = vadd.f32 %v515_v63, %v514_v55  ;;  %v556_v9 = vadd.f32 %v555_v24, %v554_v56 }
  0x67   : > { %v425_v11 = vadd.f32 %v424_v0, %v423_v57  ;;  %v463_v13 = vadd.f32 %v462_v1, %v461_v58  ;;  %v503_v14 = vadd.f32 %v502_v2, %v501_v59  ;;  %v543_v15 = vadd.f32 %v542_v5, %v541_v60 }
  0x68   : > { %v438_v16 = vrot.slane %v437_v6, 1  ;;  %v477_v17 = vrot.slane %v476_v7, 1  ;;  %v517_v19 = vrot.slane %v516_v8, 1  ;;  %v557_v20 = vrot.slane %v556_v9, 1 }
  0x69   : > { %v426_v22 = vrot.slane %v425_v11, 2  ;;  %v464_v23 = vrot.slane %v463_v13, 2  ;;  %v504_v4 = vrot.slane %v503_v14, 2  ;;  %v544_v26 = vrot.slane %v543_v15, 2 }
  0x6a   : > { %v439_v28 = vadd.f32 %v438_v16, %v437_v6  ;;  %v478_v29 = vadd.f32 %v477_v17, %v476_v7  ;;  %v518_v30 = vadd.f32 %v517_v19, %v516_v8  ;;  %v558_v32 = vadd.f32 %v557_v20, %v556_v9 }
  0x6b   : > { %v427_v33 = vadd.f32 %v426_v22, %v425_v11  ;;  %v465_v34 = vadd.f32 %v464_v23, %v463_v13  ;;  %v505_v35 = vadd.f32 %v504_v4, %v503_v14  ;;  %v545_v37 = vadd.f32 %v544_v26, %v543_v15 }
  0x6c   : > { %v440_v38 = vadd.f32 %v439_v28, %v432_v3  ;;  %v479_v39 = vadd.f32 %v896_v10, %v478_v29  ;;  %v519_v40 = vadd.f32 %v903_v18, %v518_v30  ;;  %v559_v41 = vadd.f32 %v910_v21, %v558_v32 }
  0x6d   : > { %v428_v43 = vrot.slane %v427_v33, 1  ;;  %v466_v44 = vrot.slane %v465_v34, 1  ;;  %v506_v45 = vrot.slane %v505_v35, 1  ;;  %v546_v46 = vrot.slane %v545_v37, 1 }
  0x6e   : > { %441 = vst [vmem:[%s1415_s11] sm:$0x1] %v440_v38  ;;  %v581_v49 = vrot.slane %v1530_v12, 2 }
  0x6f   : > { %897 = vst [vmem:[%s1415_s11 + $0x1] sm:$0x1] %v479_v39  ;;  %v429_v50 = vadd.f32 %v428_v43, %v427_v33  ;;  %v467_v51 = vadd.f32 %v466_v44, %v465_v34  ;;  %v507_v25 = vadd.f32 %v506_v45, %v505_v35  ;;  %v547_v31 = vadd.f32 %v546_v46, %v545_v37 }
  0x70   : > { %904 = vst [vmem:[%s1415_s11 + $0x2] sm:$0x1] %v519_v40  ;;  %v582_v36 = vadd.f32 %v581_v49, %v1530_v12 }
  0x71   : > { %911 = vst [vmem:[%s1415_s11 + $0x3] sm:$0x1] %v559_v41  ;;  %v430_v52 = vadd.f32 %v429_v50, %v421_v42  ;;  %v468_v53 = vadd.f32 %v894_v47, %v467_v51  ;;  %v508_v54 = vadd.f32 %v901_v48, %v507_v25  ;;  %v548_v55 = vadd.f32 %v908_v27, %v547_v31 }
  0x72   : > { %v583_v56 = vrot.slane %v582_v36, 1 }
  0x73   : > { %1115 = shalt.err (!%p1112_p13)
}
  0x74   : > { %s1271_s24 = smov 16   ;;  %s1272_s1 = smov 1   ;;  %431 = vst [vmem:[%s1425_s30] sm:$0x1] %v430_v52  ;;  %v577_v12 = vld [vmem:[%s1411_s29] sm:$0x1]  ;;  %v584_v57 = vadd.f32 %v583_v56, %v582_v36 }
  0x75   : > { %934 = dma.vmem_to_hbm [thread:$0]  (%p1358_p9), %s1577_s26, 64, %s636_s16, %s1598_s0, %s1271_s24, %s1271_s24, %s1272_s1  }
  0x76   : > { %s668_s22 = sshll.u32 %s1411_s29, 4  ;;  %s1736_s9 = scalar_lea.hbm %s1720_s5, %s1258_s21  ;;  %895 = vst [vmem:[%s1425_s30 + $0x1] sm:$0x1] %v468_v53  ;;  %v585_v58 = vadd.f32 %v584_v57, %v577_v12  ;;  %s1636_s22 = int_to_ptr.vmem [resolvable:$true] %s668_s22 }
  0x77   : > { %s1627_s13 = sshll.u32 %s1736_s9, 4  ;;  %902 = vst [vmem:[%s1425_s30 + $0x2] sm:$0x1] %v508_v54  ;;  %s588_s26 = scalar_lea.sflag [#allocation4], %s1395_s25  ;;  %s671_s13 = int_to_ptr.hbm [resolvable:$true] %s1627_s13 }
  0x78   : > { %909 = vst [vmem:[%s1425_s30 + $0x3] sm:$0x1] %v548_v55  ;;  %s1130_s16 = sshra.s32 %s618_s27, 4  ;;  %s1136_s14 = scalar_lea.hbm %s1717_s2, 8  ;;  %s1131_s16 = int_to_ptr.hbm [resolvable:$true] %s1130_s16 }
  0x79   : > { %s1132_s21 = scalar_lea.hbm %s1131_s16, 4  ;;  %p1137_p3 = scmp.lt.s32.totalorder %s1131_s16, %s1717_s2 }
  0x7a   : > { %p1133_p0 = scmp.ne.s32.totalorder %s1131_s16, %s1132_s21  ;;  %p1138_p4 = scmp.lt.s32.totalorder %s1136_s14, %s1132_s21 }
  0x7c   : > { %p1134_p1 = pnand %p1133_p0, %p1358_p9  ;;  %p1139_p5 = por %p1138_p4, %p1137_p3 }
  0x7e   : > { %p1135_p2 = pneg %p1134_p1 }
  0x80   : > { %p1140_p6 = pnand %p1139_p5, %p1135_p2 }
  0x82   : > { %1143 = shalt.err (!%p1140_p6)
}
  0x83   : > { %933 = dma.vmem_to_hbm [thread:$0]  (%p1358_p9), %s1593_s7, 64, %s618_s27, %s588_s26, %s1271_s24, %s1271_s24, %s1272_s1  }
  0x84   : > { %586 = vst [vmem:[%s1411_s29] sm:$0x1] %v585_v58  ;;  %s1158_s30 = sshra.s32 %s654_s15, 4  ;;  %s1164_s17 = scalar_lea.hbm %s1719_s4, 8  ;;  %s1159_s30 = int_to_ptr.hbm [resolvable:$true] %s1158_s30 }
  0x85   : > { %s1160_s9 = scalar_lea.hbm %s1159_s30, 4  ;;  %p1165_p13 = scmp.lt.s32.totalorder %s1159_s30, %s1719_s4 }
  0x86   : > { %p1161_p7 = scmp.ne.s32.totalorder %s1159_s30, %s1160_s9  ;;  %p1166_p0 = scmp.lt.s32.totalorder %s1164_s17, %s1160_s9 }
  0x88   : > { %p1162_p8 = pnand %p1161_p7, %p1358_p9  ;;  %p1167_p1 = por %p1166_p0, %p1165_p13 }
  0x8a   : > { %p1163_p10 = pneg %p1162_p8 }
  0x8c   : > { %p1168_p2 = pnand %p1167_p1, %p1163_p10 }
  0x8e   : > { %1171 = shalt.err (!%p1168_p2)
}
  0x8f   : > { %935 = dma.vmem_to_hbm [thread:$0]  (%p1358_p9), %s1633_s28, 64, %s654_s15, %s1598_s0, %s1271_s24, %s1271_s24, %s1272_s1  }
  0x90   : > { %s603_s29 = scalar_lea.sflag [#allocation12], %s1395_s25  ;;  %s1186_s7 = sshra.s32 %s671_s13, 4  ;;  %s1187_s7 = int_to_ptr.hbm [resolvable:$true] %s1186_s7 }
  0x91   : > { %s1188_s27 = scalar_lea.hbm %s1187_s7, 1  ;;  %s1192_s12 = scalar_lea.hbm %s1720_s5, 2 }
  0x92   : > { %p1189_p3 = scmp.ne.s32.totalorder %s1187_s7, %s1188_s27  ;;  %p1193_p6 = scmp.lt.s32.totalorder %s1187_s7, %s1720_s5 }
  0x93   : > { %p1194_p7 = scmp.lt.s32.totalorder %s1192_s12, %s1188_s27 }
  0x94   : > { %p1190_p4 = pnand %p1189_p3, %p1358_p9 }
  0x95   : > { %p1195_p8 = por %p1194_p7, %p1193_p6 }
  0x96   : > { %p1191_p5 = pneg %p1190_p4 }
  0x98   : > { %p1196_p10 = pnand %p1195_p8, %p1191_p5 }
  0x9a   : > { %1199 = shalt.err (!%p1196_p10)
}
  0x9b   : > { %936 = dma.vmem_to_hbm [thread:$0]  (%p1358_p9), %s1636_s22, 16, %s671_s13, %s603_s29  }
  0x9c PF: > { %s682_s25 = sand.u32 1, %s1246_s18   ;;  %p949_p13 = pnand %p881_p12, %p1367_p11 }
  0x9d   : > { %s683_s15 = scalar_lea.sflag [#allocation4], %s682_s25 }
  0x9e   : > { %p950_p0 = pneg %p949_p13 }
  0xa0   : > { %1233 = dma.done.wait (%p950_p0), %s683_s15, 64  }
  0xa1   : > { %1235 = vsyncadd (%p950_p0), %s683_s15, 4294967232  ;;  %s1737_s28 = sadd.s32 4294967294, %s1266_s23  }
  0xa2   : > { %s692_s0 = sand.u32 1, %s1737_s28  }
  0xa3   : > { %s693_s6 = scalar_lea.sflag [#allocation9], %s692_s0 }
  0xa4   : > { %1237 = dma.done.wait (%p950_p0), %s693_s6, 128  }
  0xa5   : > { %1239 = vsyncadd (%p950_p0), %s693_s6, 4294967168  ;;  %s713_s24 = scalar_lea.sflag [#allocation12], %s682_s25 }
  0xa6   : > { %1241 = dma.done.wait (%p950_p0), %s713_s24, 16  }
  0xa7   : > { %1243 = vsyncadd (%p950_p0), %s713_s24, 4294967280  ;;  %s31_s23 = sadd.s32 1, %s1266_s23   ;;  %s1738_s8 = sld [smem:[#allocation20_spill]] }
  0xa8   : > { %p28_p9 = scmp.ge.s32.totalorder %s31_s23, 4   ;;  %s1739_s21 = sld [smem:[#allocation18_spill]] }
  0xa9   : > { %s1740_s22 = sld [smem:[#allocation19_spill]]  ;;  %s1741_s18 = smov %s1250_s19 }
  0xaa   : > { %s1742_s19 = smov %s1254_s20  ;;  %30 = sbr.rel (!%p28_p9) target bundleno = 15 (0xf), region = 148 }
  0xad   : > { %s1743_s20 = smov %s1738_s8 }
  0xaf   :  { %718 = vsyncpa [#allocation3], 1 }
  0xb0   :  { %720 = vsyncpa [#allocation3 + $0x1], 1 }
  0xb1   :  { %721 = vsyncpa [#allocation6], 1 }
  0xb2   :  { %723 = vsyncpa [#allocation6 + $0x1], 1 }
  0xb3   :  { %724 = vsyncpa [#allocation4], 1 }
  0xb4   :  { %726 = vsyncpa [#allocation4 + $0x1], 1 }
  0xb5   :  { %727 = vsyncpa [#allocation9], 1 }
  0xb6   :  { %729 = vsyncpa [#allocation9 + $0x1], 1 }
  0xb7   :  { %730 = vsyncpa [#allocation12], 1 }
  0xb8   :  { %732 = vsyncpa [#allocation12 + $0x1], 1 }

</bundles_post_ra>
